<compile_context>
chip_gen: v7x
topology: tpu7x:2x2x1
jax: 0.10.0
libtpu: 0.0.40
codegen_flags: <defaults>
</compile_context>

<pallas_src>
import jax
import jax.numpy as jnp
from jax import lax
from jax.experimental import pallas as pl
from jax.experimental.pallas import tpu as pltpu


def _round_up(a, m):
    return (a + m - 1) // m * m


def _two_layer_fc_kernel(x_ref, w1_ref, b1_ref, w2_ref, b2_ref, o_ref):
    # fc1 on the MXU: (H, K) @ (TB, K)^T -> (H, TB); batch lives on lanes.
    h = lax.dot_general(
        w1_ref[...], x_ref[...],
        dimension_numbers=(((1,), (1,)), ((), ())),
        preferred_element_type=jnp.float32,
    )
    # bias + ReLU on the VPU ((H, 1) bias broadcasts across the TB lanes).
    h = jnp.maximum(h + b1_ref[...], 0.0)
    # fc2 (out_features = 1): VPU multiply + sublane reduction instead of a
    # 1-column MXU matmul; result is a lane-dense (1, TB) row.
    out = jnp.sum(h * w2_ref[...], axis=0, keepdims=True) + b2_ref[0, 0]
    o_ref[...] = out.astype(o_ref.dtype)


def _choose_tb(batch, k):
    """Largest batch tile (multiple of 128) whose double-buffered x stream fits
    comfortably under the scoped VMEM limit on all generations (incl. v7x)."""
    tb = min(2048, _round_up(batch, 128))
    stream_budget = 12 * 1024 * 1024  # 2 x-buffers, leaves room for resident w1
    while tb > 128 and 2 * tb * k * 4 > stream_budget:
        tb -= 128
    return tb


def two_layer_fc(x, fc1_w, fc1_b, fc2_w, fc2_b):
    """x: (B, K); fc1_w: (256, K); fc1_b: (256,); fc2_w: (1, 256); fc2_b: (1,).

    Weight layouts match PyTorch's nn.Linear (out_features, in_features).
    Returns (B, 1), identical semantics to fc2(relu(fc1(x))).
    """
    B, K = x.shape
    H = fc1_w.shape[0]  # 256

    tb = _choose_tb(B, K)
    b_pad = _round_up(B, tb)
    if b_pad != B:
        x = jnp.pad(x, ((0, b_pad - B), (0, 0)))

    # TODO(synk): for very large input_num (w1 ~ 256*K*4 bytes approaching half
    # the v7x VMEM budget), add a K grid axis with a VMEM fc1 accumulator and
    # finalize ReLU + fc2 under pl.when on the last K step.

    grid = (b_pad // tb,)
    cost = pl.CostEstimate(
        flops=2 * b_pad * K * H + 3 * b_pad * H,
        transcendentals=0,
        bytes_accessed=b_pad * K * 4 + H * K * 4 + H * 8 + b_pad * 4,
    )

    out_row = pl.pallas_call(
        _two_layer_fc_kernel,
        out_shape=jax.ShapeDtypeStruct((1, b_pad), x.dtype),
        grid_spec=pltpu.PrefetchScalarGridSpec(
            num_scalar_prefetch=0,
            grid=grid,
            in_specs=[
                pl.BlockSpec((tb, K), lambda i: (i, 0)),   # streamed x tile
                pl.BlockSpec((H, K), lambda i: (0, 0)),    # resident fc1 weight
                pl.BlockSpec((H, 1), lambda i: (0, 0)),    # resident fc1 bias
                pl.BlockSpec((H, 1), lambda i: (0, 0)),    # resident fc2 weight
                pl.BlockSpec(memory_space=pltpu.MemorySpace.SMEM),  # fc2 bias scalar
            ],
            out_specs=pl.BlockSpec((1, tb), lambda i: (0, i)),  # lane-dense output
        ),
        compiler_params=pltpu.CompilerParams(
            dimension_semantics=("parallel",),
            vmem_limit_bytes=32 * 1024 * 1024,
        ),
        cost_estimate=cost,
    )(
        x,
        fc1_w,
        fc1_b.reshape(H, 1),
        fc2_w.reshape(H, 1),
        fc2_b.reshape(1, 1),
    )
    return out_row[0, :B].reshape(B, 1)


if __name__ == "__main__":
    key = jax.random.PRNGKey(0)
    k_x, k_w1, k_b1, k_w2, k_b2 = jax.random.split(key, 5)

    batch, input_num, hidden = 8, 32, 256
    x = jax.random.normal(k_x, (batch, input_num), dtype=jnp.float32)

    # Deterministic init mimicking PyTorch Linear: U(-1/sqrt(fan_in), 1/sqrt(fan_in)),
    # weights stored in PyTorch's (out_features, in_features) layout.
    bound1 = 1.0 / (input_num ** 0.5)
    bound2 = 1.0 / (hidden ** 0.5)
    fc1_w = jax.random.uniform(k_w1, (hidden, input_num), jnp.float32, -bound1, bound1)
    fc1_b = jax.random.uniform(k_b1, (hidden,), jnp.float32, -bound1, bound1)
    fc2_w = jax.random.uniform(k_w2, (1, hidden), jnp.float32, -bound2, bound2)
    fc2_b = jax.random.uniform(k_b2, (1,), jnp.float32, -bound2, bound2)

    out = two_layer_fc(x, fc1_w, fc1_b, fc2_w, fc2_b)
    out = jax.block_until_ready(out)

    # Plain-JAX reference of the PyTorch forward semantics.
    ref = jnp.maximum(x @ fc1_w.T + fc1_b, 0.0) @ fc2_w.T + fc2_b
    assert out.shape == (batch, 1)
    assert jnp.allclose(out, ref, atol=1e-4, rtol=1e-4), float(jnp.max(jnp.abs(out - ref)))

    print("KERNEL_OK")
</pallas_src>

<mosaic_0001>
module attributes {stable_mosaic.version = 11 : i64} {
  func.func @_two_layer_fc_kernel(%arg0: i32, %arg1: memref<128x32xf32, #tpu.memory_space<vmem>>, %arg2: memref<256x32xf32, #tpu.memory_space<vmem>>, %arg3: memref<256x1xf32, #tpu.memory_space<vmem>>, %arg4: memref<256x1xf32, #tpu.memory_space<vmem>>, %arg5: memref<1x1xf32, #tpu.memory_space<smem>>, %arg6: memref<1x128xf32, #tpu.memory_space<vmem>>) attributes {dimension_semantics = [#tpu.dimension_semantics<parallel>], iteration_bounds = array<i64: 1>, scalar_prefetch = 0 : i64, scratch_operands = 0 : i64, tpu.core_type = #tpu.core_type<tc>, window_params = [{transform_indices = @transform_0, window_bounds = array<i64: 128, 32>}, {pipeline_mode = #tpu.pipeline_mode<synchronous>, transform_indices = @transform_1, window_bounds = array<i64: 256, 32>}, {pipeline_mode = #tpu.pipeline_mode<synchronous>, transform_indices = @transform_2, window_bounds = array<i64: 256, 1>}, {pipeline_mode = #tpu.pipeline_mode<synchronous>, transform_indices = @transform_3, window_bounds = array<i64: 256, 1>}, {transform_indices = @transform_4, window_bounds = array<i64: 1, 1>}, {transform_indices = @transform_5, window_bounds = array<i64: 1, 128>}]} {
    %c0 = arith.constant 0 : index
    %c0_0 = arith.constant 0 : index
    %0 = vector.load %arg2[%c0, %c0_0] : memref<256x32xf32, #tpu.memory_space<vmem>>, vector<256x32xf32>
    %c0_1 = arith.constant 0 : index
    %c0_2 = arith.constant 0 : index
    %1 = vector.load %arg1[%c0_1, %c0_2] : memref<128x32xf32, #tpu.memory_space<vmem>>, vector<128x32xf32>
    %cst = arith.constant dense<0.000000e+00> : vector<256x128xf32>
    %2 = tpu.matmul %0, %1, %cst {dimension_numbers = #tpu.dot_dimension_numbers<[1], [1], [0], [0], [0, 0, 1, 0], [], []>} : vector<256x32xf32>, vector<128x32xf32>, vector<256x128xf32> -> vector<256x128xf32>
    %c0_3 = arith.constant 0 : index
    %c0_4 = arith.constant 0 : index
    %3 = vector.load %arg3[%c0_3, %c0_4] : memref<256x1xf32, #tpu.memory_space<vmem>>, vector<256x1xf32>
    %4 = vector.broadcast %3 : vector<256x1xf32> to vector<256x128xf32>
    %5 = arith.addf %2, %4 : vector<256x128xf32>
    %cst_5 = arith.constant 0.000000e+00 : f32
    %6 = vector.broadcast %cst_5 : f32 to vector<256x128xf32>
    %7 = arith.maximumf %5, %6 : vector<256x128xf32>
    %c0_6 = arith.constant 0 : index
    %c0_7 = arith.constant 0 : index
    %8 = vector.load %arg4[%c0_6, %c0_7] : memref<256x1xf32, #tpu.memory_space<vmem>>, vector<256x1xf32>
    %9 = vector.broadcast %8 : vector<256x1xf32> to vector<256x128xf32>
    %10 = arith.mulf %7, %9 : vector<256x128xf32>
    %cst_8 = arith.constant dense<0.000000e+00> : vector<128xf32>
    %11 = vector.multi_reduction <add>, %10, %cst_8 [0] : vector<256x128xf32> to vector<128xf32>
    %12 = vector.shape_cast %11 : vector<128xf32> to vector<1x128xf32>
    %c0_9 = arith.constant 0 : index
    %c0_10 = arith.constant 0 : index
    %13 = memref.load %arg5[%c0_9, %c0_10] : memref<1x1xf32, #tpu.memory_space<smem>>
    %14 = vector.broadcast %13 : f32 to vector<1x128xf32>
    %15 = arith.addf %12, %14 : vector<1x128xf32>
    %c0_11 = arith.constant 0 : index
    %c0_12 = arith.constant 0 : index
    %16 = vector.load %arg6[%c0_11, %c0_12] : memref<1x128xf32, #tpu.memory_space<vmem>>, vector<1x128xf32>
    tpu.vector_store %arg6[%c0_11, %c0_12], %15 {strides = array<i32>} : memref<1x128xf32, #tpu.memory_space<vmem>>, vector<1x128xf32>,
    return
  }
  func.func @transform_0(%arg0: i32) -> (i32, i32) {
    %c0_i32 = arith.constant 0 : i32
    %c0_i32_0 = arith.constant 0 : i32
    return %arg0, %c0_i32 : i32, i32
  }
  func.func @transform_1(%arg0: i32) -> (i32, i32) {
    %c0_i32 = arith.constant 0 : i32
    %c0_i32_0 = arith.constant 0 : i32
    %c0_i32_1 = arith.constant 0 : i32
    return %c0_i32, %c0_i32_0 : i32, i32
  }
  func.func @transform_2(%arg0: i32) -> (i32, i32) {
    %c0_i32 = arith.constant 0 : i32
    %c0_i32_0 = arith.constant 0 : i32
    %c0_i32_1 = arith.constant 0 : i32
    return %c0_i32, %c0_i32_0 : i32, i32
  }
  func.func @transform_3(%arg0: i32) -> (i32, i32) {
    %c0_i32 = arith.constant 0 : i32
    %c0_i32_0 = arith.constant 0 : i32
    %c0_i32_1 = arith.constant 0 : i32
    return %c0_i32, %c0_i32_0 : i32, i32
  }
  func.func @transform_4(%arg0: i32) -> (i32, i32) {
    %c0_i32 = arith.constant 0 : i32
    %c0_i32_0 = arith.constant 0 : i32
    %c0_i32_1 = arith.constant 0 : i32
    return %c0_i32, %c0_i32_0 : i32, i32
  }
  func.func @transform_5(%arg0: i32) -> (i32, i32) {
    %c0_i32 = arith.constant 0 : i32
    %c0_i32_0 = arith.constant 0 : i32
    return %c0_i32, %arg0 : i32, i32
  }
}

</mosaic_0001>

<bundles_post_ra>
// kernel: tpu_custom_call.1
= control target key start
LH: loop header
LB: loop body
LE: loop exit
PB: predicated region body
PF: predicated region fallthrough
CT: control target
= control target key end

     0   :  { %vm262_vm0 = vcmask 261120   ;;  %v1211_v3 = vmov 0   ;;  %s1858_s0 = inlined_call_operand.vmem [shape: f32[128,32], index: 0, kind: input, shape index: {}]   ;;  %s1859_s1 = inlined_call_operand.vmem [shape: f32[256,32], index: 1, kind: input, shape index: {}]   ;;  %s1860_s2 = inlined_call_operand.vmem [shape: f32[256,1], index: 2, kind: input, shape index: {}]   ;;  %s1861_s3 = inlined_call_operand.vmem [shape: f32[256,1], index: 3, kind: input, shape index: {}]   ;;  %s1862_s4 = inlined_call_operand.<no memory space> [shape: f32[1,1], index: 4, kind: input, shape index: {}]   ;;  %s1863_s5 = inlined_call_operand.hbm [shape: f32[1,128], index: 5, kind: output, shape index: {}]  }
   0x1   :  { %v72_v0 = vld [vmem:[%s1860_s2 + $0x10] sm:$0xff]  ;;  %v70_v1 = vld [vmem:[%s1860_s2] sm:$0xff]  ;;  %1186 = vset.pattern.permute.xlu1 %v1211_v3  ;;  %1185 = vset.pattern.permute.xlu0 %v1211_v3  ;;  %v55_v4 = vld [vmem:[%s1858_s0 + $0x8] sm:$0xff] }
   0x2   :  { %v54_v2 = vld [vmem:[%s1858_s0] sm:$0xff]  ;;  %vm1257_vm1 = vmpackc.low %vm262_vm0, %vm262_vm0  ;;  %114 = vperm.xlu1 %1186, %v72_v0   ;;  %104 = vperm.xlu0 %1185, %v70_v1   ;;  %v73_v7 = vld [vmem:[%s1860_s2 + $0x18] sm:$0xff] }
   0x3   :  { %v1119_v6 = vpack.c.bf16 %v55_v4, %v54_v2  ;;  %v71_v8 = vld [vmem:[%s1860_s2 + $0x8] sm:$0xff]  ;;  %v56_v9 = vld [vmem:[%s1858_s0 + $0x10] sm:$0xff]  ;;  %v57_v10 = vld [vmem:[%s1858_s0 + $0x18] sm:$0xff] }
   0x4   :  { %v1125_v11 = vpack.c.bf16 %v57_v10, %v56_v9  ;;  %v75_v12 = vld [vmem:[%s1860_s2 + $0x28] sm:$0xff]  ;;  %v74_v13 = vld [vmem:[%s1860_s2 + $0x20] sm:$0xff]  ;;  %v77_v16 = vld [vmem:[%s1860_s2 + $0x38] sm:$0xff] }
   0x5   :  { %1121 = vmatprep.subr.msk.bf16.mxu0 %vm1257_vm1, %v1119_v6  ;;  %1167 = vmatprep.subr.msk.bf16.mxu1 %vm1257_vm1, %v1119_v6  ;;  %v58_v14 = vld [vmem:[%s1858_s0 + $0x20] sm:$0xff]  ;;  %v59_v15 = vld [vmem:[%s1858_s0 + $0x28] sm:$0xff]  ;;  %v76_v17 = vld [vmem:[%s1860_s2 + $0x30] sm:$0xff] }
   0x6   :  { %1124 = vmatpush3.bf16.xpose.msk.msra.mxu0 %vm1257_vm1, %v1119_v6  ;;  %1175 = vmatpush3.bf16.xpose.msk.msra.mxu1 %vm1257_vm1, %v1119_v6  ;;  %v1131_v18 = vpack.c.bf16 %v59_v15, %v58_v14  ;;  %v79_v19 = vld [vmem:[%s1860_s2 + $0x48] sm:$0xff]  ;;  %v78_v20 = vld [vmem:[%s1860_s2 + $0x40] sm:$0xff]  ;;  %v60_v21 = vld [vmem:[%s1858_s0 + $0x30] sm:$0xff] }
   0x7   :  { %119 = vperm.xlu1 %1186, %v73_v7   ;;  %109 = vperm.xlu0 %1185, %v71_v8   ;;  %v61_v22 = vld [vmem:[%s1858_s0 + $0x38] sm:$0xff]  ;;  %v22_v23 = vld [vmem:[%s1859_s1] sm:$0xff]  ;;  %v80_v26 = vld [vmem:[%s1860_s2 + $0x50] sm:$0xff] }
   0x8   :  { %1127 = vmatprep.subr.msk.bf16.mxu0 %vm1257_vm1, %v1125_v11  ;;  %1168 = vmatprep.subr.msk.bf16.mxu1 %vm1257_vm1, %v1125_v11  ;;  %v38_v24 = vld [vmem:[%s1859_s1 + $0x80] sm:$0xff]  ;;  %v81_v25 = vld [vmem:[%s1860_s2 + $0x58] sm:$0xff]  ;;  %v1137_v27 = vpack.c.bf16 %v61_v22, %v60_v21  ;;  %v83_v28 = vld [vmem:[%s1860_s2 + $0x68] sm:$0xff] }
   0x9   :  { %1071 = vmatprep.mubr.msk.f32.mxu0 %vm262_vm0, %v22_v23  ;;  %1095 = vmatprep.mubr.msk.f32.mxu1 %vm262_vm0, %v38_v24  ;;  %v82_v29 = vld [vmem:[%s1860_s2 + $0x60] sm:$0xff]  ;;  %v63_v31 = vld [vmem:[%s1858_s0 + $0x48] sm:$0xff]  ;;  %v85_v32 = vld [vmem:[%s1860_s2 + $0x78] sm:$0xff] }
   0xa   :  { %v62_v30 = vld [vmem:[%s1858_s0 + $0x40] sm:$0xff]  ;;  %v84_v33 = vld [vmem:[%s1860_s2 + $0x70] sm:$0xff]  ;;  %v87_v35 = vld [vmem:[%s1860_s2 + $0x88] sm:$0xff] }
   0xb   :  { %129 = vperm.xlu1 %1186, %v75_v12   ;;  %124 = vperm.xlu0 %1185, %v74_v13   ;;  %v1143_v34 = vpack.c.bf16 %v63_v31, %v62_v30  ;;  %v86_v36 = vld [vmem:[%s1860_s2 + $0x80] sm:$0xff]  ;;  %v64_v37 = vld [vmem:[%s1858_s0 + $0x50] sm:$0xff]  ;;  %v65_v38 = vld [vmem:[%s1858_s0 + $0x58] sm:$0xff] }
   0xc   :  { %v89_v39 = vld [vmem:[%s1860_s2 + $0x98] sm:$0xff]  ;;  %v88_v40 = vld [vmem:[%s1860_s2 + $0x90] sm:$0xff]  ;;  %v1149_v41 = vpack.c.bf16 %v65_v38, %v64_v37 }
   0xe   :  { %1130 = vmatpush3.bf16.xpose.msk.msra.mxu0 %vm1257_vm1, %v1125_v11  ;;  %1176 = vmatpush3.bf16.xpose.msk.msra.mxu1 %vm1257_vm1, %v1125_v11 }
   0xf   :  { %139 = vperm.xlu1 %1186, %v77_v16   ;;  %134 = vperm.xlu0 %1185, %v76_v17  }
  0x10   :  { %1133 = vmatprep.subr.msk.bf16.mxu0 %vm1257_vm1, %v1131_v18  ;;  %1169 = vmatprep.subr.msk.bf16.mxu1 %vm1257_vm1, %v1131_v18 }
  0x13   :  { %149 = vperm.xlu1 %1186, %v79_v19   ;;  %144 = vperm.xlu0 %1185, %v78_v20  }
  0x16   :  { %1136 = vmatpush3.bf16.xpose.msk.msra.mxu0 %vm1257_vm1, %v1131_v18  ;;  %1177 = vmatpush3.bf16.xpose.msk.msra.mxu1 %vm1257_vm1, %v1131_v18 }
  0x17   :  { %159 = vperm.xlu1 %1186, %v81_v25   ;;  %154 = vperm.xlu0 %1185, %v80_v26  }
  0x18   :  { %1139 = vmatprep.subr.msk.bf16.mxu0 %vm1257_vm1, %v1137_v27  ;;  %1170 = vmatprep.subr.msk.bf16.mxu1 %vm1257_vm1, %v1137_v27 }
  0x1b   :  { %169 = vperm.xlu1 %1186, %v83_v28   ;;  %164 = vperm.xlu0 %1185, %v82_v29  }
  0x1e   :  { %1142 = vmatpush3.bf16.xpose.msk.msra.mxu0 %vm1257_vm1, %v1137_v27  ;;  %1178 = vmatpush3.bf16.xpose.msk.msra.mxu1 %vm1257_vm1, %v1137_v27 }
  0x1f   :  { %179 = vperm.xlu1 %1186, %v85_v32   ;;  %174 = vperm.xlu0 %1185, %v84_v33  }
  0x20   :  { %1145 = vmatprep.subr.msk.bf16.mxu0 %vm1257_vm1, %v1143_v34  ;;  %1171 = vmatprep.subr.msk.bf16.mxu1 %vm1257_vm1, %v1143_v34 }
  0x23   :  { %189 = vperm.xlu1 %1186, %v87_v35   ;;  %184 = vperm.xlu0 %1185, %v86_v36  }
  0x26   :  { %1148 = vmatpush3.bf16.xpose.msk.msra.mxu0 %vm1257_vm1, %v1143_v34  ;;  %1179 = vmatpush3.bf16.xpose.msk.msra.mxu1 %vm1257_vm1, %v1143_v34 }
  0x27   :  { %11 = vsyncpa [#allocation4], 0  ;;  %199 = vperm.xlu1 %1186, %v89_v39   ;;  %194 = vperm.xlu0 %1185, %v88_v40   ;;  %v91_v42 = vld [vmem:[%s1860_s2 + $0xa8] sm:$0xff]  ;;  %v90_v43 = vld [vmem:[%s1860_s2 + $0xa0] sm:$0xff]  ;;  %s1212_s10 = smov [#allocation3]  }
  0x28   :  { %1151 = vmatprep.subr.msk.bf16.mxu0 %vm1257_vm1, %v1149_v41  ;;  %1172 = vmatprep.subr.msk.bf16.mxu1 %vm1257_vm1, %v1149_v41  ;;  %v66_v44 = vld [vmem:[%s1858_s0 + $0x60] sm:$0xff]  ;;  %v67_v45 = vld [vmem:[%s1858_s0 + $0x68] sm:$0xff]  ;;  %v93_v46 = vld [vmem:[%s1860_s2 + $0xb8] sm:$0xff] }
  0x29   :  { %v92_v47 = vld [vmem:[%s1860_s2 + $0xb0] sm:$0xff]  ;;  %v1155_v48 = vpack.c.bf16 %v67_v45, %v66_v44  ;;  %v95_v49 = vld [vmem:[%s1860_s2 + $0xc8] sm:$0xff]  ;;  %v94_v50 = vld [vmem:[%s1860_s2 + $0xc0] sm:$0xff] }
  0x2a   :  { %v68_v51 = vld [vmem:[%s1858_s0 + $0x70] sm:$0xff]  ;;  %v69_v52 = vld [vmem:[%s1858_s0 + $0x78] sm:$0xff]  ;;  %v665_v56 = vld [vmem:[%s1861_s3 + $0x8] sm:$0xff] }
  0x2b   :  { %209 = vperm.xlu1 %1186, %v91_v42   ;;  %204 = vperm.xlu0 %1185, %v90_v43   ;;  %v97_v53 = vld [vmem:[%s1860_s2 + $0xd8] sm:$0xff]  ;;  %v96_v54 = vld [vmem:[%s1860_s2 + $0xd0] sm:$0xff]  ;;  %v1161_v55 = vpack.c.bf16 %v69_v52, %v68_v51  ;;  %v664_v57 = vld [vmem:[%s1861_s3] sm:$0xff] }
  0x2c   :  { %v667_v58 = vld [vmem:[%s1861_s3 + $0x18] sm:$0xff]  ;;  %v666_v59 = vld [vmem:[%s1861_s3 + $0x10] sm:$0xff]  ;;  %v669_v60 = vld [vmem:[%s1861_s3 + $0x28] sm:$0xff] }
  0x2d   :  { %v668_v61 = vld [vmem:[%s1861_s3 + $0x20] sm:$0xff]  ;;  %v23_v62 = vld [vmem:[%s1859_s1 + $0x8] sm:$0xff]  ;;  %v24_v0 = vld [vmem:[%s1859_s1 + $0x10] sm:$0xff] }
  0x2e   :  { %1154 = vmatpush3.bf16.xpose.msk.msra.mxu0 %vm1257_vm1, %v1149_v41  ;;  %1180 = vmatpush3.bf16.xpose.msk.msra.mxu1 %vm1257_vm1, %v1149_v41  ;;  %v39_v63 = vld [vmem:[%s1859_s1 + $0x88] sm:$0xff]  ;;  %v40_v1 = vld [vmem:[%s1859_s1 + $0x90] sm:$0xff]  ;;  %v671_v2 = vld [vmem:[%s1861_s3 + $0x38] sm:$0xff] }
  0x2f   :  { %219 = vperm.xlu1 %1186, %v93_v46   ;;  %214 = vperm.xlu0 %1185, %v92_v47   ;;  %v670_v3 = vld [vmem:[%s1861_s3 + $0x30] sm:$0xff]  ;;  %v25_v4 = vld [vmem:[%s1859_s1 + $0x18] sm:$0xff]  ;;  %v26_v6 = vld [vmem:[%s1859_s1 + $0x20] sm:$0xff] }
  0x30   :  { %1157 = vmatprep.subr.msk.bf16.mxu0 %vm1257_vm1, %v1155_v48  ;;  %1173 = vmatprep.subr.msk.bf16.mxu1 %vm1257_vm1, %v1155_v48  ;;  %v41_v5 = vld [vmem:[%s1859_s1 + $0x98] sm:$0xff]  ;;  %v42_v7 = vld [vmem:[%s1859_s1 + $0xa0] sm:$0xff]  ;;  %v673_v8 = vld [vmem:[%s1861_s3 + $0x48] sm:$0xff] }
  0x31   :  { %v672_v9 = vld [vmem:[%s1861_s3 + $0x40] sm:$0xff]  ;;  %v27_v10 = vld [vmem:[%s1859_s1 + $0x28] sm:$0xff]  ;;  %v28_v12 = vld [vmem:[%s1859_s1 + $0x30] sm:$0xff] }
  0x32   :  { %v43_v11 = vld [vmem:[%s1859_s1 + $0xa8] sm:$0xff]  ;;  %v44_v13 = vld [vmem:[%s1859_s1 + $0xb0] sm:$0xff]  ;;  %v675_v14 = vld [vmem:[%s1861_s3 + $0x58] sm:$0xff] }
  0x33   :  { %229 = vperm.xlu1 %1186, %v95_v49   ;;  %224 = vperm.xlu0 %1185, %v94_v50   ;;  %v674_v15 = vld [vmem:[%s1861_s3 + $0x50] sm:$0xff]  ;;  %v29_v16 = vld [vmem:[%s1859_s1 + $0x38] sm:$0xff]  ;;  %v30_v18 = vld [vmem:[%s1859_s1 + $0x40] sm:$0xff] }
  0x34   :  { %v45_v17 = vld [vmem:[%s1859_s1 + $0xb8] sm:$0xff]  ;;  %v46_v19 = vld [vmem:[%s1859_s1 + $0xc0] sm:$0xff]  ;;  %v677_v20 = vld [vmem:[%s1861_s3 + $0x68] sm:$0xff] }
  0x35   :  { %v676_v21 = vld [vmem:[%s1861_s3 + $0x60] sm:$0xff]  ;;  %v31_v22 = vld [vmem:[%s1859_s1 + $0x48] sm:$0xff]  ;;  %v32_v24 = vld [vmem:[%s1859_s1 + $0x50] sm:$0xff] }
  0x36   :  { %1160 = vmatpush3.bf16.xpose.msk.msra.mxu0 %vm1257_vm1, %v1155_v48  ;;  %1181 = vmatpush3.bf16.xpose.msk.msra.mxu1 %vm1257_vm1, %v1155_v48  ;;  %v47_v23 = vld [vmem:[%s1859_s1 + $0xc8] sm:$0xff]  ;;  %v48_v25 = vld [vmem:[%s1859_s1 + $0xd0] sm:$0xff]  ;;  %v679_v26 = vld [vmem:[%s1861_s3 + $0x78] sm:$0xff] }
  0x37   :  { %239 = vperm.xlu1 %1186, %v97_v53   ;;  %234 = vperm.xlu0 %1185, %v96_v54   ;;  %v678_v27 = vld [vmem:[%s1861_s3 + $0x70] sm:$0xff]  ;;  %v33_v28 = vld [vmem:[%s1859_s1 + $0x58] sm:$0xff]  ;;  %v34_v30 = vld [vmem:[%s1859_s1 + $0x60] sm:$0xff] }
  0x38   :  { %1163 = vmatprep.subr.msk.bf16.mxu0 %vm1257_vm1, %v1161_v55  ;;  %1174 = vmatprep.subr.msk.bf16.mxu1 %vm1257_vm1, %v1161_v55  ;;  %v49_v29 = vld [vmem:[%s1859_s1 + $0xd8] sm:$0xff]  ;;  %v50_v31 = vld [vmem:[%s1859_s1 + $0xe0] sm:$0xff]  ;;  %v681_v32 = vld [vmem:[%s1861_s3 + $0x88] sm:$0xff] }
  0x39   :  { %v680_v33 = vld [vmem:[%s1861_s3 + $0x80] sm:$0xff]  ;;  %v35_v34 = vld [vmem:[%s1859_s1 + $0x68] sm:$0xff]  ;;  %v36_v36 = vld [vmem:[%s1859_s1 + $0x70] sm:$0xff] }
  0x3a   :  { %v51_v35 = vld [vmem:[%s1859_s1 + $0xe8] sm:$0xff]  ;;  %v52_v37 = vld [vmem:[%s1859_s1 + $0xf0] sm:$0xff]  ;;  %v683_v38 = vld [vmem:[%s1861_s3 + $0x98] sm:$0xff] }
  0x3b   :  { %703 = vperm.xlu1 %1186, %v665_v56   ;;  %698 = vperm.xlu0 %1185, %v664_v57   ;;  %v682_v39 = vld [vmem:[%s1861_s3 + $0x90] sm:$0xff]  ;;  %v37_v40 = vld [vmem:[%s1859_s1 + $0x78] sm:$0xff]  ;;  %v685_v42 = vld [vmem:[%s1861_s3 + $0xa8] sm:$0xff] }
  0x3c   :  { %v53_v41 = vld [vmem:[%s1859_s1 + $0xf8] sm:$0xff]  ;;  %v684_v43 = vld [vmem:[%s1861_s3 + $0xa0] sm:$0xff]  ;;  %v686_v45 = vld [vmem:[%s1861_s3 + $0xb0] sm:$0xff]  ;;  %s935_s1 = sshll.u32 %s1212_s10, 4  ;;  %s936_s1 = int_to_ptr.vmem [resolvable:$true] %s935_s1 }
  0x3d   :  { %v687_v44 = vld [vmem:[%s1861_s3 + $0xb8] sm:$0xff]  ;;  %v689_v46 = vld [vmem:[%s1861_s3 + $0xc8] sm:$0xff]  ;;  %v688_v47 = vld [vmem:[%s1861_s3 + $0xc0] sm:$0xff]  ;;  %s1187_s11 = scalar_lea.vmem %s936_s1, 16  ;;  %s1191_s12 = scalar_lea.vmem %s936_s1, 32 }
  0x3e   :  { %1166 = vmatpush3.bf16.xpose.msk.msra.mxu0 %vm1257_vm1, %v1161_v55  ;;  %1182 = vmatpush3.bf16.xpose.msk.msra.mxu1 %vm1257_vm1, %v1161_v55  ;;  %v690_v48 = vld [vmem:[%s1861_s3 + $0xd0] sm:$0xff]  ;;  %v98_v49 = vld [vmem:[%s1860_s2 + $0xe0] sm:$0xff]  ;;  %v691_v50 = vld [vmem:[%s1861_s3 + $0xd8] sm:$0xff]  ;;  %p1188_p0 = scmp.ne.s32.totalorder %s936_s1, %s1187_s11  ;;  %p1192_p1 = scmp.lt.s32.totalorder %s936_s1, %s936_s1 }
  0x3f   :  { %713 = vperm.xlu1 %1186, %v667_v58   ;;  %708 = vperm.xlu0 %1185, %v666_v59   ;;  %v99_v51 = vld [vmem:[%s1860_s2 + $0xe8] sm:$0xff]  ;;  %v692_v52 = vld [vmem:[%s1861_s3 + $0xe0] sm:$0xff]  ;;  %v100_v53 = vld [vmem:[%s1860_s2 + $0xf0] sm:$0xff]  ;;  %p1193_p2 = scmp.lt.s32.totalorder %s1191_s12, %s1187_s11 }
  0x40   :  { %v693_v54 = vld [vmem:[%s1861_s3 + $0xe8] sm:$0xff]  ;;  %v101_v55 = vld [vmem:[%s1860_s2 + $0xf8] sm:$0xff]  ;;  %v694_v57 = vld [vmem:[%s1861_s3 + $0xf0] sm:$0xff] }
  0x41   :  { %v695_v56 = vld [vmem:[%s1861_s3 + $0xf8] sm:$0xff]  ;;  %p1194_p3 = por %p1193_p2, %p1192_p1 }
  0x43   :  { %723 = vperm.xlu1 %1186, %v669_v60   ;;  %718 = vperm.xlu0 %1185, %v668_v61   ;;  %p1195_p4 = pnand %p1194_p3, %p1188_p0 }
  0x45   :  { %1072 = vmatmul.mubr.msk.f32.vlgmr.msra.gmra.mrb[0].mxu0 %vm262_vm0, %v23_v62  ;;  %1096 = vmatmul.mubr.msk.f32.vlgmr.msra.gmra.mrb[0].mxu1 %vm262_vm0, %v39_v63 }
  0x46   :  { %1074 = vmatprep.mubr.msk.f32.mxu0 %vm262_vm0, %v24_v0  ;;  %1098 = vmatprep.mubr.msk.f32.mxu1 %vm262_vm0, %v40_v1 }
  0x47   :  { %733 = vperm.xlu1 %1186, %v671_v2   ;;  %728 = vperm.xlu0 %1185, %v670_v3  }
  0x49   :  { %1075 = vmatmul.mubr.msk.f32.gmra.mrb[2].mxu0 %vm262_vm0, %v25_v4  ;;  %1099 = vmatmul.mubr.msk.f32.gmra.mrb[2].mxu1 %vm262_vm0, %v41_v5 }
  0x4a   :  { %1077 = vmatprep.mubr.msk.f32.mxu0 %vm262_vm0, %v26_v6  ;;  %1101 = vmatprep.mubr.msk.f32.mxu1 %vm262_vm0, %v42_v7 }
  0x4b   :  { %743 = vperm.xlu1 %1186, %v673_v8   ;;  %738 = vperm.xlu0 %1185, %v672_v9  }
  0x4d   :  { %1078 = vmatmul.mubr.msk.f32.gmra.mrb[4].mxu0 %vm262_vm0, %v27_v10  ;;  %1102 = vmatmul.mubr.msk.f32.gmra.mrb[4].mxu1 %vm262_vm0, %v43_v11 }
  0x4e   :  { %1080 = vmatprep.mubr.msk.f32.mxu0 %vm262_vm0, %v28_v12  ;;  %1104 = vmatprep.mubr.msk.f32.mxu1 %vm262_vm0, %v44_v13 }
  0x4f   :  { %753 = vperm.xlu1 %1186, %v675_v14   ;;  %748 = vperm.xlu0 %1185, %v674_v15  }
  0x51   :  { %1081 = vmatmul.mubr.msk.f32.gmra.mrb[6].mxu0 %vm262_vm0, %v29_v16  ;;  %1105 = vmatmul.mubr.msk.f32.gmra.mrb[6].mxu1 %vm262_vm0, %v45_v17 }
  0x52   :  { %1083 = vmatprep.mubr.msk.f32.mxu0 %vm262_vm0, %v30_v18  ;;  %1107 = vmatprep.mubr.msk.f32.mxu1 %vm262_vm0, %v46_v19 }
  0x53   :  { %763 = vperm.xlu1 %1186, %v677_v20   ;;  %758 = vperm.xlu0 %1185, %v676_v21  }
  0x55   :  { %1084 = vmatmul.mubr.msk.f32.gmra.mrb[8].mxu0 %vm262_vm0, %v31_v22  ;;  %1108 = vmatmul.mubr.msk.f32.gmra.mrb[8].mxu1 %vm262_vm0, %v47_v23 }
  0x56   :  { %1086 = vmatprep.mubr.msk.f32.mxu0 %vm262_vm0, %v32_v24  ;;  %1110 = vmatprep.mubr.msk.f32.mxu1 %vm262_vm0, %v48_v25 }
  0x57   :  { %773 = vperm.xlu1 %1186, %v679_v26   ;;  %768 = vperm.xlu0 %1185, %v678_v27  }
  0x59   :  { %1087 = vmatmul.mubr.msk.f32.gmra.mrb[10].mxu0 %vm262_vm0, %v33_v28  ;;  %1111 = vmatmul.mubr.msk.f32.gmra.mrb[10].mxu1 %vm262_vm0, %v49_v29 }
  0x5a   :  { %1089 = vmatprep.mubr.msk.f32.mxu0 %vm262_vm0, %v34_v30  ;;  %1113 = vmatprep.mubr.msk.f32.mxu1 %vm262_vm0, %v50_v31 }
  0x5b   :  { %783 = vperm.xlu1 %1186, %v681_v32   ;;  %778 = vperm.xlu0 %1185, %v680_v33  }
  0x5d   :  { %1090 = vmatmul.mubr.msk.f32.gmra.mrb[12].mxu0 %vm262_vm0, %v35_v34  ;;  %1114 = vmatmul.mubr.msk.f32.gmra.mrb[12].mxu1 %vm262_vm0, %v51_v35 }
  0x5e   :  { %1092 = vmatprep.mubr.msk.f32.mxu0 %vm262_vm0, %v36_v36  ;;  %1116 = vmatprep.mubr.msk.f32.mxu1 %vm262_vm0, %v52_v37 }
  0x5f   :  { %793 = vperm.xlu1 %1186, %v683_v38   ;;  %788 = vperm.xlu0 %1185, %v682_v39  }
  0x61   :  { %1093 = vmatmul.mubr.msk.f32.gmra.mrb[14].mxu0 %vm262_vm0, %v37_v40  ;;  %1117 = vmatmul.mubr.msk.f32.gmra.mrb[14].mxu1 %vm262_vm0, %v53_v41 }
  0x63   :  { %803 = vperm.xlu1 %1186, %v685_v42   ;;  %798 = vperm.xlu0 %1185, %v684_v43  }
  0x67   :  { %813 = vperm.xlu1 %1186, %v687_v44   ;;  %808 = vperm.xlu0 %1185, %v686_v45  }
  0x6b   :  { %823 = vperm.xlu1 %1186, %v689_v46   ;;  %818 = vperm.xlu0 %1185, %v688_v47  }
  0x6f   :  { %828 = vperm.xlu1 %1186, %v690_v48   ;;  %244 = vperm.xlu0 %1185, %v98_v49  }
  0x73   :  { %833 = vperm.xlu1 %1186, %v691_v50   ;;  %249 = vperm.xlu0 %1185, %v99_v51  }
  0x77   :  { %838 = vperm.xlu1 %1186, %v692_v52   ;;  %254 = vperm.xlu0 %1185, %v100_v53  }
  0x7b   :  { %843 = vperm.xlu1 %1186, %v693_v54   ;;  %259 = vperm.xlu0 %1185, %v101_v55  }
  0x7f   :  { %853 = vperm.xlu1 %1186, %v695_v56   ;;  %848 = vperm.xlu0 %1185, %v694_v57  }
  0x81   :  { %v105_v58 = vpop.permute.xlu0 %104  ;;  %v115_v59 = vpop.permute.xlu1 %114 }
  0x86   :  { %v110_v60 = vpop.permute.xlu0 %109  ;;  %v120_v61 = vpop.permute.xlu1 %119 }
  0x8a   :  { %v1681_v62 = vpop.permute.xlu0 %124  ;;  %v130_v63 = vpop.permute.xlu1 %129 }
  0x8e   :  { %v1683_v0 = vpop.permute.xlu0 %134  ;;  %v1685_v1 = vpop.permute.xlu1 %139 }
  0x92   :  { %v1687_v2 = vpop.permute.xlu0 %144  ;;  %v1689_v3 = vpop.permute.xlu1 %149 }
  0x96   :  { %v1691_v4 = vpop.permute.xlu0 %154  ;;  %v1693_v5 = vpop.permute.xlu1 %159 }
  0x9a   :  { %v1695_v6 = vpop.permute.xlu0 %164  ;;  %v1697_v7 = vpop.permute.xlu1 %169 }
  0x9e   :  { %v1699_v8 = vpop.permute.xlu0 %174  ;;  %v1701_v9 = vpop.permute.xlu1 %179 }
  0xa2   :  { %v1703_v10 = vpop.permute.xlu0 %184  ;;  %v1705_v11 = vpop.permute.xlu1 %189 }
  0xa6   :  { %v1707_v12 = vpop.permute.xlu0 %194  ;;  %v1709_v13 = vpop.permute.xlu1 %199 }
  0xaa   :  { %v1711_v14 = vpop.permute.xlu0 %204  ;;  %v1713_v15 = vpop.permute.xlu1 %209 }
  0xae   :  { %v1715_v16 = vpop.permute.xlu0 %214  ;;  %v1717_v17 = vpop.permute.xlu1 %219 }
  0xb2   :  { %v1719_v18 = vpop.permute.xlu0 %224  ;;  %v1721_v19 = vpop.permute.xlu1 %229 }
  0xb6   :  { %v1723_v20 = vpop.permute.xlu0 %234  ;;  %v1725_v21 = vpop.permute.xlu1 %239 }
  0xb7   :  { %1866 = vst [vmem:[#allocation6_spill] sm:$0xff] %v1725_v21 }
  0xba   :  { %v699_v22 = vpop.permute.xlu0 %698  ;;  %v704_v23 = vpop.permute.xlu1 %703 }
  0xbe   :  { %v709_v24 = vpop.permute.xlu0 %708  ;;  %v714_v25 = vpop.permute.xlu1 %713 }
  0xc2   :  { %v719_v26 = vpop.permute.xlu0 %718  ;;  %v724_v27 = vpop.permute.xlu1 %723 }
  0xc6   :  { %v729_v28 = vpop.permute.xlu0 %728  ;;  %v1727_v29 = vpop.permute.xlu1 %733 }
  0xca   :  { %v1729_v30 = vpop.permute.xlu0 %738  ;;  %v1731_v31 = vpop.permute.xlu1 %743 }
  0xce   :  { %v1733_v32 = vpop.permute.xlu0 %748  ;;  %v1735_v33 = vpop.permute.xlu1 %753 }
  0xd2   :  { %v1737_v34 = vpop.permute.xlu0 %758  ;;  %v1739_v35 = vpop.permute.xlu1 %763 }
  0xd6   :  { %v1741_v36 = vpop.permute.xlu0 %768  ;;  %v1743_v37 = vpop.permute.xlu1 %773 }
  0xda   :  { %v1749_v44 = vpop.permute.xlu0 %778  ;;  %v1755_v55 = vpop.permute.xlu1 %783 }
 0x118   :  { %v1073_v38 = vpop.f32.mrb[0].mxu0  ;;  %v1745_v39 = vpop.f32.mrb[0].mxu1 }
 0x119   :  { %v479_v40 = vadd.f32 %v1073_v38, %v110_v60  ;;  %v473_v41 = vpop.f32.mrb[1].mxu0  ;;  %v1747_v42 = vpop.f32.mrb[1].mxu1 }
 0x11a   :  { %v474_v43 = vadd.f32 %v473_v41, %v105_v58 }
 0x11b   :  { %v633_v45 = vmax.f32 %v479_v40, 0.0 }
 0x11c   :  { %v632_v46 = vmax.f32 %v474_v43, 0.0  ;;  %v1076_v47 = vpop.f32.mrb[2].mxu0  ;;  %v1751_v48 = vpop.f32.mrb[2].mxu1 }
 0x11d   :  { %v857_v49 = vmul.f32 %v704_v23, %v633_v45  ;;  %v489_v50 = vadd.f32 %v1076_v47, %v120_v61  ;;  %v483_v51 = vpop.f32.mrb[3].mxu0  ;;  %v1753_v52 = vpop.f32.mrb[3].mxu1 }
 0x11e   :  { %v856_v53 = vmul.f32 %v699_v22, %v632_v46  ;;  %v484_v54 = vadd.f32 %v483_v51, %v115_v59  ;;  %v1762_v23 = vpop.permute.xlu0 %788 }
 0x11f   :  { %v635_v57 = vmax.f32 %v489_v50, 0.0 }
 0x120   :  { %v888_v56 = vadd.f32 %v857_v49, %v856_v53  ;;  %v634_v60 = vmax.f32 %v484_v54, 0.0  ;;  %v1079_v58 = vpop.f32.mrb[4].mxu0  ;;  %v1757_v38 = vpop.f32.mrb[4].mxu1 }
 0x121   :  { %v499_v40 = vadd.f32 %v1079_v58, %v130_v63  ;;  %v493_v41 = vpop.f32.mrb[5].mxu0  ;;  %v1759_v43 = vpop.f32.mrb[5].mxu1  ;;  %v859_v45 = vmul.f32 %v714_v25, %v635_v57 }
 0x122   :  { %v858_v21 = vmul.f32 %v709_v24, %v634_v60  ;;  %v494_v61 = vadd.f32 %v493_v41, %v1681_v62  ;;  %v1770_v60 = vpop.permute.xlu1 %793 }
 0x123   :  { %v637_v59 = vmax.f32 %v499_v40, 0.0 }
 0x124   :  { %v889_v22 = vadd.f32 %v888_v56, %v858_v21  ;;  %v636_v46 = vmax.f32 %v494_v61, 0.0  ;;  %v1082_v47 = vpop.f32.mrb[6].mxu0  ;;  %v1764_v49 = vpop.f32.mrb[6].mxu1 }
 0x125   :  { %v509_v50 = vadd.f32 %v1082_v47, %v1685_v1  ;;  %v503_v51 = vpop.f32.mrb[7].mxu0  ;;  %v1767_v53 = vpop.f32.mrb[7].mxu1  ;;  %v861_v62 = vmul.f32 %v724_v27, %v637_v59 }
 0x126   :  { %v860_v63 = vmul.f32 %v719_v26, %v636_v46  ;;  %v890_v54 = vadd.f32 %v889_v22, %v859_v45  ;;  %v504_v24 = vadd.f32 %v503_v51, %v1683_v0  ;;  %v1778_v45 = vpop.permute.xlu0 %798 }
 0x127   :  { %v639_v25 = vmax.f32 %v509_v50, 0.0 }
 0x128   :  { %v891_v58 = vadd.f32 %v890_v54, %v860_v63  ;;  %v638_v21 = vmax.f32 %v504_v24, 0.0  ;;  %v1085_v56 = vpop.f32.mrb[8].mxu0  ;;  %v1772_v57 = vpop.f32.mrb[8].mxu1 }
 0x129   :  { %v519_v40 = vadd.f32 %v1085_v56, %v1689_v3  ;;  %v513_v41 = vpop.f32.mrb[9].mxu0  ;;  %v1775_v1 = vpop.f32.mrb[9].mxu1  ;;  %v863_v0 = vmul.f32 %v1727_v29, %v639_v25 }
 0x12a   :  { %v862_v61 = vmul.f32 %v729_v28, %v638_v21  ;;  %v892_v47 = vadd.f32 %v891_v58, %v861_v62  ;;  %v514_v26 = vadd.f32 %v513_v41, %v1687_v2  ;;  %v1788_v24 = vpop.permute.xlu1 %803 }
 0x12b   :  { %v641_v22 = vmax.f32 %v519_v40, 0.0 }
 0x12c   :  { %v893_v27 = vadd.f32 %v892_v47, %v862_v61  ;;  %v640_v59 = vmax.f32 %v514_v26, 0.0  ;;  %v1088_v46 = vpop.f32.mrb[10].mxu0  ;;  %v1781_v50 = vpop.f32.mrb[10].mxu1 }
 0x12d   :  { %v529_v51 = vadd.f32 %v1088_v46, %v1693_v5  ;;  %v523_v3 = vpop.f32.mrb[11].mxu0  ;;  %v1784_v63 = vpop.f32.mrb[11].mxu1  ;;  %v865_v29 = vmul.f32 %v1731_v31, %v641_v22 }
 0x12e   :  { %v864_v28 = vmul.f32 %v1729_v30, %v640_v59  ;;  %v894_v54 = vadd.f32 %v893_v27, %v863_v0  ;;  %v524_v2 = vadd.f32 %v523_v3, %v1691_v4  ;;  %v809_v47 = vpop.permute.xlu0 %808 }
 0x12f   :  { %v643_v58 = vmax.f32 %v529_v51, 0.0 }
 0x130   :  { %v895_v62 = vadd.f32 %v894_v54, %v864_v28  ;;  %v642_v25 = vmax.f32 %v524_v2, 0.0  ;;  %v1091_v21 = vpop.f32.mrb[12].mxu0  ;;  %v1791_v56 = vpop.f32.mrb[12].mxu1  ;;  %v559_v54 = vadd.f32 %v1745_v39, %v1705_v11 }
 0x131   :  { %v539_v5 = vadd.f32 %v1091_v21, %v1697_v7  ;;  %v533_v40 = vpop.f32.mrb[13].mxu0  ;;  %v1794_v41 = vpop.f32.mrb[13].mxu1  ;;  %v867_v26 = vmul.f32 %v1735_v33, %v643_v58 }
 0x132   :  { %v866_v30 = vmul.f32 %v1733_v32, %v642_v25  ;;  %v896_v61 = vadd.f32 %v895_v62, %v865_v29  ;;  %v534_v4 = vadd.f32 %v533_v40, %v1695_v6  ;;  %v554_v32 = vadd.f32 %v1747_v42, %v1703_v10  ;;  %v814_v33 = vpop.permute.xlu1 %813 }
 0x133   :  { %v645_v0 = vmax.f32 %v539_v5, 0.0  ;;  %v564_v25 = vadd.f32 %v1753_v52, %v1707_v12  ;;  %v649_v21 = vmax.f32 %v559_v54, 0.0  ;;  %v579_v52 = vadd.f32 %v1757_v38, %v1713_v15 }
 0x134   :  { %v897_v31 = vadd.f32 %v896_v61, %v866_v30  ;;  %v644_v27 = vmax.f32 %v534_v4, 0.0  ;;  %v1094_v22 = vpop.f32.mrb[14].mxu0  ;;  %v1799_v59 = vpop.f32.mrb[14].mxu1  ;;  %v648_v58 = vmax.f32 %v554_v32, 0.0  ;;  %v574_v30 = vadd.f32 %v1759_v43, %v1711_v14 }
 0x135   :  { %v549_v46 = vadd.f32 %v1094_v22, %v1701_v9  ;;  %v543_v7 = vpop.f32.mrb[15].mxu0  ;;  %v1802_v51 = vpop.f32.mrb[15].mxu1  ;;  %v869_v2 = vmul.f32 %v1739_v35, %v645_v0  ;;  %v650_v40 = vmax.f32 %v564_v25, 0.0  ;;  %v873_v12 = vmul.f32 %v1755_v55, %v649_v21 }
 0x136   :  { %v868_v3 = vmul.f32 %v1737_v34, %v644_v27  ;;  %v898_v6 = vadd.f32 %v897_v31, %v867_v26  ;;  %v544_v28 = vadd.f32 %v543_v7, %v1699_v8  ;;  %v819_v34 = vpop.permute.xlu0 %818  ;;  %v569_v8 = vadd.f32 %v1751_v48, %v1709_v13  ;;  %v824_v39 = vpop.permute.xlu1 %823 }
 0x137   :  { %v647_v62 = vmax.f32 %v549_v46, 0.0  ;;  %v872_v35 = vmul.f32 %v1749_v44, %v648_v58  ;;  %v874_v13 = vmul.f32 %v1762_v23, %v650_v40  ;;  %v584_v48 = vadd.f32 %v1767_v53, %v1715_v16 }
 0x138   :  { %v899_v29 = vadd.f32 %v898_v6, %v868_v3  ;;  %v646_v9 = vmax.f32 %v544_v28, 0.0  ;;  %v653_v14 = vmax.f32 %v579_v52, 0.0  ;;  %v589_v55 = vadd.f32 %v1764_v49, %v1717_v17  ;;  %v1867_v28 = vld [vmem:[#allocation6_spill] sm:$0xff] }
 0x139   :  { %v871_v5 = vmul.f32 %v1743_v37, %v647_v62  ;;  %v652_v37 = vmax.f32 %v574_v30, 0.0  ;;  %v654_v15 = vmax.f32 %v584_v48, 0.0  ;;  %v594_v38 = vadd.f32 %v1775_v1, %v1719_v18 }
 0x13a   :  { %v870_v10 = vmul.f32 %v1741_v36, %v646_v9  ;;  %v900_v42 = vadd.f32 %v899_v29, %v869_v2  ;;  %v651_v36 = vmax.f32 %v569_v8, 0.0  ;;  %v245_v26 = vpop.permute.xlu0 %244  ;;  %v829_v31 = vpop.permute.xlu1 %828  ;;  %v877_v46 = vmul.f32 %v1788_v24, %v653_v14 }
 0x13b   :  { %v876_v27 = vmul.f32 %v1778_v45, %v652_v37  ;;  %v655_v16 = vmax.f32 %v589_v55, 0.0  ;;  %v599_v53 = vadd.f32 %v1772_v57, %v1721_v19  ;;  %v878_v32 = vmul.f32 %v809_v47, %v654_v15 }
 0x13c   :  { %v901_v11 = vadd.f32 %v900_v42, %v870_v10  ;;  %v875_v0 = vmul.f32 %v1770_v60, %v651_v36  ;;  %v656_v3 = vmax.f32 %v594_v38, 0.0  ;;  %v604_v17 = vadd.f32 %v1784_v63, %v1723_v20 }
 0x13d   :  { %v879_v45 = vmul.f32 %v814_v33, %v655_v16  ;;  %v657_v6 = vmax.f32 %v599_v53, 0.0  ;;  %v609_v18 = vadd.f32 %v1781_v50, %v1867_v28  ;;  %v614_v29 = vadd.f32 %v1794_v41, %v245_v26 }
 0x13e   :  { %v902_v61 = vadd.f32 %v901_v11, %v871_v5  ;;  %v250_v22 = vpop.permute.xlu0 %249  ;;  %v834_v7 = vpop.permute.xlu1 %833  ;;  %v880_v24 = vmul.f32 %v819_v34, %v656_v3  ;;  %v658_v2 = vmax.f32 %v604_v17, 0.0  ;;  %v926_v48 = vstv %s1862_s4 }
 0x13f   :  { %v881_v62 = vmul.f32 %v824_v39, %v657_v6  ;;  %v659_v47 = vmax.f32 %v609_v18, 0.0  ;;  %v619_v9 = vadd.f32 %v1791_v56, %v250_v22  ;;  %v660_v63 = vmax.f32 %v614_v29, 0.0 }
 0x140   :  { %v903_v4 = vadd.f32 %v902_v61, %v872_v35  ;;  %v882_v20 = vmul.f32 %v829_v31, %v658_v2 }
 0x141   :  { %v883_v50 = vmul.f32 %v834_v7, %v659_v47  ;;  %v661_v42 = vmax.f32 %v619_v9, 0.0 }
 0x142   :  { %v904_v44 = vadd.f32 %v903_v4, %v873_v12  ;;  %v255_v54 = vpop.permute.xlu0 %254  ;;  %v839_v57 = vpop.permute.xlu1 %838 }
 0x143   :  { %v624_v33 = vadd.f32 %v1802_v51, %v255_v54  ;;  %v884_v41 = vmul.f32 %v839_v57, %v660_v63 }
 0x144   :  { %v905_v43 = vadd.f32 %v904_v44, %v874_v13 }
 0x145   :  { %v662_v5 = vmax.f32 %v624_v33, 0.0 }
 0x146   :  { %v906_v23 = vadd.f32 %v905_v43, %v875_v0  ;;  %v260_v10 = vpop.permute.xlu0 %259  ;;  %v844_v8 = vpop.permute.xlu1 %843 }
 0x147   :  { %v629_v34 = vadd.f32 %v1799_v59, %v260_v10  ;;  %v885_v39 = vmul.f32 %v844_v8, %v661_v42 }
 0x148   :  { %v907_v60 = vadd.f32 %v906_v23, %v876_v27 }
 0x149   :  { %v663_v35 = vmax.f32 %v629_v34, 0.0 }
 0x14a   :  { %v908_v49 = vadd.f32 %v907_v60, %v877_v46  ;;  %v849_v56 = vpop.permute.xlu0 %848  ;;  %v854_v12 = vpop.permute.xlu1 %853 }
 0x14b   :  { %v886_v30 = vmul.f32 %v849_v56, %v662_v5  ;;  %v887_v36 = vmul.f32 %v854_v12, %v663_v35 }
 0x14c   :  { %v909_v1 = vadd.f32 %v908_v49, %v878_v32 }
 0x14e   :  { %v910_v19 = vadd.f32 %v909_v1, %v879_v45 }
 0x150   :  { %v911_v58 = vadd.f32 %v910_v19, %v880_v24 }
 0x152   :  { %v912_v25 = vadd.f32 %v911_v58, %v881_v62 }
 0x154   :  { %v913_v21 = vadd.f32 %v912_v25, %v882_v20 }
 0x156   :  { %v914_v11 = vadd.f32 %v913_v21, %v883_v50 }
 0x158   :  { %v915_v40 = vadd.f32 %v914_v11, %v884_v41 }
 0x15a   :  { %v916_v61 = vadd.f32 %v915_v40, %v885_v39 }
 0x15c   :  { %v917_v51 = vadd.f32 %v916_v61, %v886_v30 }
 0x15e   :  { %v918_v52 = vadd.f32 %v917_v51, %v887_v36 }
 0x160   :  { %v919_v4 = vrot.slane %v918_v52, 4 }
 0x162   :  { %v920_v26 = vadd.f32 %v919_v4, %v918_v52 }
 0x164   :  { %v921_v13 = vrot.slane %v920_v26, 2 }
 0x166   :  { %v922_v37 = vadd.f32 %v921_v13, %v920_v26 }
 0x168   :  { %v923_v59 = vrot.slane %v922_v37, 1 }
 0x16a   :  { %v924_v44 = vadd.f32 %v923_v59, %v922_v37 }
 0x16c   :  { %v927_v31 = vadd.f32 %v926_v48, %v924_v44 }
 0x16e   :  { %928 = vst [vmem:[#allocation3] sm:$0x1] %v927_v31 }
 0x16f   :  { %1198 = shalt.err (!%p1195_p4)
}
 0x170   :  { %s1199_s15 = scalar_lea.hbm %s1863_s5, 16 }
 0x171   :  { %p1200_p5 = scmp.ne.s32.totalorder %s1863_s5, %s1199_s15  ;;  %p1203_p6 = scmp.lt.u32.totalorder %s1199_s15, %s1863_s5 }
 0x173   :  { %p1205_p7 = pnand %p1203_p6, %p1200_p5 }
 0x175   :  { %1208 = shalt.err (!%p1205_p7)
}
 0x176   :  { %938 = dma.vmem_to_hbm [thread:$0]  %s936_s1, 16, %s1863_s5, [#allocation4]  }
 0x177   :  { %1209 = dma.done.wait [#allocation4], 16  }
 0x178   :  { %1210 = vsyncadd [#allocation4], 4294967280 }
 0x179   :  { %942 = vsyncpa [#allocation4], 1 }

</bundles_post_ra>
